<compile_context>
chip_gen: v7x
topology: tpu7x:2x2x1
jax: 0.10.0
libtpu: 0.0.40
codegen_flags: <defaults>
</compile_context>

<pallas_src>
import jax
import jax.numpy as jnp
import numpy as np
from jax.experimental import pallas as pl
from jax.experimental.pallas import tpu as pltpu


# ----------------------------- Pallas kernel ---------------------------------
def attn_decoder_kernel(
    tok_ref,      # SMEM (1,) int32      decoder input token id
    emb_tab_ref,  # HBM  (V, H)          embedding table (only 1 row is DMA'd)
    hid_ref,      # VMEM (1, H)          previous hidden state h_{t-1}
    enc_ref,      # VMEM (L, H)          encoder outputs
    w_emb_ref,    # VMEM (H, L+H)        [W_attn_emb | W_combine_emb]
    w_h_ref,      # VMEM (H, L+3H)       [W_attn_hid | W_hh (r,z,n)]
    w_ca_ref,     # VMEM (H, H)          W_combine_attn_applied
    w_ih_ref,     # VMEM (H, 3H)         W_ih (r,z,n)
    w_out_ref,    # VMEM (H, V)          output Linear (transposed)
    b_attn_ref,   # VMEM (1, L)
    b_comb_ref,   # VMEM (1, H)
    b_ih_ref,     # VMEM (1, 3H)
    b_hh_ref,     # VMEM (1, 3H)
    b_out_ref,    # VMEM (1, V)
    logp_ref,     # out  (1, V)          log-softmax over vocab
    hid_out_ref,  # out  (1, H)          new hidden state
    attnw_ref,    # out  (1, L)          attention weights
    emb_buf,      # scratch VMEM (1, H)  gathered embedding row
    dma_sem,      # scratch DMA semaphore
):
    f32 = jnp.float32
    H = hid_ref.shape[-1]
    L = attnw_ref.shape[-1]

    # In-kernel embedding row gather: one (1, H) DMA from HBM, overlapped with the
    # hidden-state matmul below.
    tok = tok_ref[0]
    cp = pltpu.make_async_copy(emb_tab_ref.at[pl.ds(tok, 1)], emb_buf, dma_sem)
    cp.start()

    h = hid_ref[...]                                                   # (1, H)
    # Fused: attention(hidden part) + all three GRU hidden-gate matmuls in one MXU push.
    ho = jnp.dot(h, w_h_ref[...], preferred_element_type=f32)          # (1, L+3H)

    cp.wait()
    emb = emb_buf[...]                                                 # (1, H)
    # (dropout = eval-mode identity)

    # Fused: attention(embedded part) + attn_combine(embedded part).
    eo = jnp.dot(emb, w_emb_ref[...], preferred_element_type=f32)      # (1, L+H)

    # --- attn_weights = softmax(attn(cat(embedded, hidden))) ------------------
    attn_logits = eo[:, :L] + ho[:, :L] + b_attn_ref[...]              # (1, L)
    m = jnp.max(attn_logits, axis=-1, keepdims=True)
    e = jnp.exp(attn_logits - m)
    # exact reciprocal (approx=True would also pass to the EUP, but keep 1e-4 test exact)
    attn_w = e * pl.reciprocal(jnp.sum(e, axis=-1, keepdims=True), approx=False)
    attnw_ref[...] = attn_w

    # --- attn_applied = attn_weights @ encoder_outputs -------------------------
    attn_applied = jnp.dot(attn_w, enc_ref[...], preferred_element_type=f32)   # (1, H)

    # --- output = relu(attn_combine(cat(embedded, attn_applied))) --------------
    x = eo[:, L:] + jnp.dot(attn_applied, w_ca_ref[...],
                            preferred_element_type=f32) + b_comb_ref[...]
    x = jnp.maximum(x, 0.0)                                            # (1, H)

    # --- single-step GRU cell (gate order r, z, n), gates fused -----------------
    gi = jnp.dot(x, w_ih_ref[...], preferred_element_type=f32) + b_ih_ref[...]  # (1, 3H)
    gh = ho[:, L:] + b_hh_ref[...]                                               # (1, 3H)

    r = jax.nn.sigmoid(gi[:, :H] + gh[:, :H])
    z = jax.nn.sigmoid(gi[:, H:2 * H] + gh[:, H:2 * H])
    n = jnp.tanh(gi[:, 2 * H:] + r * gh[:, 2 * H:])
    h_new = (1.0 - z) * n + z * h                                      # (1, H)
    hid_out_ref[...] = h_new

    # --- output = log_softmax(out(h_new)) ---------------------------------------
    out_logits = jnp.dot(h_new, w_out_ref[...], preferred_element_type=f32) + b_out_ref[...]
    mo = jnp.max(out_logits, axis=-1, keepdims=True)
    lse = mo + jnp.log(jnp.sum(jnp.exp(out_logits - mo), axis=-1, keepdims=True))
    logp_ref[...] = out_logits - lse                                   # (1, V)


# ------------------------------ packing + wrapper ------------------------------
def pack_params(p):
    """Repack PyTorch-layout params into fused, transposed kernel weights (done once)."""
    H = p["comb_w"].shape[0]
    return {
        "emb": p["embedding"],                                           # (V, H) stays in HBM
        # emb path: [attn (emb cols) | attn_combine (emb cols)]  -> (H, L+H)
        "w_emb": jnp.concatenate([p["attn_w"][:, :H].T, p["comb_w"][:, :H].T], axis=1),
        # hidden path: [attn (hid cols) | GRU W_hh (r,z,n)]      -> (H, L+3H)
        "w_h": jnp.concatenate([p["attn_w"][:, H:].T, p["gru_w_hh"].T], axis=1),
        "w_ca": p["comb_w"][:, H:].T,                                    # (H, H)
        "w_ih": p["gru_w_ih"].T,                                         # (H, 3H)
        "w_out": p["out_w"].T,                                           # (H, V)
        "b_attn": p["attn_b"][None, :],
        "b_comb": p["comb_b"][None, :],
        "b_ih": p["gru_b_ih"][None, :],
        "b_hh": p["gru_b_hh"][None, :],
        "b_out": p["out_b"][None, :],
    }


def attn_decoder_forward(token, hidden, encoder_outputs, packed):
    """Mirrors AttnDecoderRNN.forward (eval mode) on packed params.

    token: int / scalar int32; hidden: (1, 1, H); encoder_outputs: (L, H)
    returns (log_probs (1, V), hidden (1, 1, H), attn_weights (1, L))
    """
    H = packed["b_comb"].shape[-1]
    L = packed["b_attn"].shape[-1]
    V = packed["b_out"].shape[-1]

    tok_arr = jnp.full((1,), token, dtype=jnp.int32)
    hid_in = hidden.reshape(1, H)

    vmem = pl.BlockSpec(memory_space=pltpu.MemorySpace.VMEM)

    logp, hid_out, attn_w = pl.pallas_call(
        attn_decoder_kernel,
        out_shape=(
            jax.ShapeDtypeStruct((1, V), jnp.float32),
            jax.ShapeDtypeStruct((1, H), jnp.float32),
            jax.ShapeDtypeStruct((1, L), jnp.float32),
        ),
        in_specs=[
            pl.BlockSpec(memory_space=pltpu.MemorySpace.SMEM),   # token id
            pl.BlockSpec(memory_space=pl.ANY),                   # embedding table in HBM
            vmem,  # hidden
            vmem,  # encoder_outputs
            vmem,  # w_emb
            vmem,  # w_h
            vmem,  # w_ca
            vmem,  # w_ih
            vmem,  # w_out
            vmem,  # b_attn
            vmem,  # b_comb
            vmem,  # b_ih
            vmem,  # b_hh
            vmem,  # b_out
        ],
        out_specs=(vmem, vmem, vmem),
        scratch_shapes=[
            pltpu.VMEM((1, H), jnp.float32),     # gathered embedding row
            pltpu.SemaphoreType.DMA,             # its DMA semaphore
        ],
    )(
        tok_arr, packed["emb"], hid_in, encoder_outputs,
        packed["w_emb"], packed["w_h"], packed["w_ca"], packed["w_ih"], packed["w_out"],
        packed["b_attn"], packed["b_comb"], packed["b_ih"], packed["b_hh"], packed["b_out"],
    )
    return logp, hid_out.reshape(1, 1, H), attn_w


# --------------------------- pure-JAX reference (PyTorch layout) ----------------
def attn_decoder_reference(token, hidden, encoder_outputs, p):
    H = p["comb_w"].shape[0]
    emb = p["embedding"][token][None, :]
    h = hidden.reshape(1, H)
    attn_logits = jnp.concatenate([emb, h], axis=1) @ p["attn_w"].T + p["attn_b"]
    attn_w = jax.nn.softmax(attn_logits, axis=1)
    attn_applied = attn_w @ encoder_outputs
    x = jax.nn.relu(jnp.concatenate([emb, attn_applied], axis=1) @ p["comb_w"].T + p["comb_b"])
    gi = x @ p["gru_w_ih"].T + p["gru_b_ih"]
    gh = h @ p["gru_w_hh"].T + p["gru_b_hh"]
    r = jax.nn.sigmoid(gi[:, :H] + gh[:, :H])
    z = jax.nn.sigmoid(gi[:, H:2 * H] + gh[:, H:2 * H])
    n = jnp.tanh(gi[:, 2 * H:] + r * gh[:, 2 * H:])
    h_new = (1.0 - z) * n + z * h
    logp = jax.nn.log_softmax(h_new @ p["out_w"].T + p["out_b"], axis=1)
    return logp, h_new.reshape(1, 1, H), attn_w


# ------------------------------- main -------------------------------------------
def make_params(key, hidden_size, output_size, max_length):
    H, V, L = hidden_size, output_size, max_length
    ks = jax.random.split(key, 11)
    s = 0.1
    return {
        "embedding": jax.random.normal(ks[0], (V, H), jnp.float32) * s,
        "attn_w":    jax.random.normal(ks[1], (L, 2 * H), jnp.float32) * s,
        "attn_b":    jax.random.normal(ks[2], (L,), jnp.float32) * s,
        "comb_w":    jax.random.normal(ks[3], (H, 2 * H), jnp.float32) * s,
        "comb_b":    jax.random.normal(ks[4], (H,), jnp.float32) * s,
        "gru_w_ih":  jax.random.normal(ks[5], (3 * H, H), jnp.float32) * s,
        "gru_b_ih":  jax.random.normal(ks[6], (3 * H,), jnp.float32) * s,
        "gru_w_hh":  jax.random.normal(ks[7], (3 * H, H), jnp.float32) * s,
        "gru_b_hh":  jax.random.normal(ks[8], (3 * H,), jnp.float32) * s,
        "out_w":     jax.random.normal(ks[9], (V, H), jnp.float32) * s,
        "out_b":     jax.random.normal(ks[10], (V,), jnp.float32) * s,
    }


if __name__ == "__main__":
    HIDDEN = 32     # hidden_size
    VOCAB = 64      # output_size
    MAXLEN = 128    # max_length (small stand-in for 10000)

    key = jax.random.PRNGKey(0)
    kp, kh, ke = jax.random.split(key, 3)
    params = make_params(kp, HIDDEN, VOCAB, MAXLEN)
    packed = pack_params(params)

    token = 5                                                        # decoder input token id
    hidden = jax.random.normal(kh, (1, 1, HIDDEN), jnp.float32)      # previous hidden state
    encoder_outputs = jax.random.normal(ke, (MAXLEN, HIDDEN), jnp.float32)

    logp, hid_new, attn_w = jax.block_until_ready(
        attn_decoder_forward(token, hidden, encoder_outputs, packed)
    )

    logp_r, hid_r, attn_r = attn_decoder_reference(token, hidden, encoder_outputs, params)
    np.testing.assert_allclose(np.asarray(logp), np.asarray(logp_r), rtol=1e-4, atol=1e-4)
    np.testing.assert_allclose(np.asarray(hid_new), np.asarray(hid_r), rtol=1e-4, atol=1e-4)
    np.testing.assert_allclose(np.asarray(attn_w), np.asarray(attn_r), rtol=1e-4, atol=1e-4)

    assert logp.shape == (1, VOCAB)
    assert hid_new.shape == (1, 1, HIDDEN)
    assert attn_w.shape == (1, MAXLEN)
    print("KERNEL_OK")
</pallas_src>

<mosaic_0001>
module attributes {stable_mosaic.version = 11 : i64} {
  func.func @attn_decoder_kernel(%arg0: memref<1xi32, #tpu.memory_space<smem>>, %arg1: memref<64x32xf32, #tpu.memory_space<any>>, %arg2: memref<1x32xf32, #tpu.memory_space<vmem>>, %arg3: memref<128x32xf32, #tpu.memory_space<vmem>>, %arg4: memref<32x160xf32, #tpu.memory_space<vmem>>, %arg5: memref<32x224xf32, #tpu.memory_space<vmem>>, %arg6: memref<32x32xf32, #tpu.memory_space<vmem>>, %arg7: memref<32x96xf32, #tpu.memory_space<vmem>>, %arg8: memref<32x64xf32, #tpu.memory_space<vmem>>, %arg9: memref<1x128xf32, #tpu.memory_space<vmem>>, %arg10: memref<1x32xf32, #tpu.memory_space<vmem>>, %arg11: memref<1x96xf32, #tpu.memory_space<vmem>>, %arg12: memref<1x96xf32, #tpu.memory_space<vmem>>, %arg13: memref<1x64xf32, #tpu.memory_space<vmem>>, %arg14: memref<1x64xf32, #tpu.memory_space<vmem>>, %arg15: memref<1x32xf32, #tpu.memory_space<vmem>>, %arg16: memref<1x128xf32, #tpu.memory_space<vmem>>, %arg17: memref<1x32xf32, #tpu.memory_space<vmem>>, %arg18: memref<!tpu.dma_semaphore, #tpu.memory_space<semaphore_mem>>) attributes {dimension_semantics = [], scalar_prefetch = 0 : i64, scratch_operands = 2 : i64, tpu.core_type = #tpu.core_type<tc>} {
    %c0 = arith.constant 0 : index
    %0 = memref.load %arg0[%c0] : memref<1xi32, #tpu.memory_space<smem>>
    %c0_i32 = arith.constant 0 : i32
    %1 = tpu.memref_slice %arg1[%0, %c0_i32] : memref<64x32xf32, #tpu.memory_space<any>> -> memref<1x32xf32, #tpu.memory_space<any>>
    tpu.enqueue_dma source(%1 : memref<1x32xf32, #tpu.memory_space<any>>) target(%arg17 : memref<1x32xf32, #tpu.memory_space<vmem>>) target_semaphore(%arg18 : memref<!tpu.dma_semaphore, #tpu.memory_space<semaphore_mem>>)
    %c0_0 = arith.constant 0 : index
    %c0_1 = arith.constant 0 : index
    %2 = vector.load %arg2[%c0_0, %c0_1] : memref<1x32xf32, #tpu.memory_space<vmem>>, vector<1x32xf32>
    %c0_2 = arith.constant 0 : index
    %c0_3 = arith.constant 0 : index
    %3 = vector.load %arg5[%c0_2, %c0_3] : memref<32x224xf32, #tpu.memory_space<vmem>>, vector<32x224xf32>
    %cst = arith.constant dense<0.000000e+00> : vector<1x224xf32>
    %4 = tpu.matmul %2, %3, %cst {dimension_numbers = #tpu.dot_dimension_numbers<[1], [0], [0], [1], [0, 0, 1, 1], [], []>} : vector<1x32xf32>, vector<32x224xf32>, vector<1x224xf32> -> vector<1x224xf32>
    %c0_i32_4 = arith.constant 0 : i32
    %5 = tpu.memref_slice %arg1[%0, %c0_i32_4] : memref<64x32xf32, #tpu.memory_space<any>> -> memref<1x32xf32, #tpu.memory_space<any>>
    tpu.wait_dma2 semaphore(%arg18 : memref<!tpu.dma_semaphore, #tpu.memory_space<semaphore_mem>>) src(%5 : memref<1x32xf32, #tpu.memory_space<any>>) dst(%arg17 : memref<1x32xf32, #tpu.memory_space<vmem>>)
    %c0_5 = arith.constant 0 : index
    %c0_6 = arith.constant 0 : index
    %6 = vector.load %arg17[%c0_5, %c0_6] : memref<1x32xf32, #tpu.memory_space<vmem>>, vector<1x32xf32>
    %c0_7 = arith.constant 0 : index
    %c0_8 = arith.constant 0 : index
    %7 = vector.load %arg4[%c0_7, %c0_8] : memref<32x160xf32, #tpu.memory_space<vmem>>, vector<32x160xf32>
    %cst_9 = arith.constant dense<0.000000e+00> : vector<1x160xf32>
    %8 = tpu.matmul %6, %7, %cst_9 {dimension_numbers = #tpu.dot_dimension_numbers<[1], [0], [0], [1], [0, 0, 1, 1], [], []>} : vector<1x32xf32>, vector<32x160xf32>, vector<1x160xf32> -> vector<1x160xf32>
    %9 = vector.extract_strided_slice %8 {offsets = [0, 0], sizes = [1, 128], strides = [1, 1]} : vector<1x160xf32> to vector<1x128xf32>
    %10 = vector.extract_strided_slice %4 {offsets = [0, 0], sizes = [1, 128], strides = [1, 1]} : vector<1x224xf32> to vector<1x128xf32>
    %11 = arith.addf %9, %10 : vector<1x128xf32>
    %c0_10 = arith.constant 0 : index
    %c0_11 = arith.constant 0 : index
    %12 = vector.load %arg9[%c0_10, %c0_11] : memref<1x128xf32, #tpu.memory_space<vmem>>, vector<1x128xf32>
    %13 = arith.addf %11, %12 : vector<1x128xf32>
    %cst_12 = arith.constant dense<0xFF800000> : vector<1xf32>
    %14 = vector.multi_reduction <maximumf>, %13, %cst_12 [1] : vector<1x128xf32> to vector<1xf32>
    %15 = vector.shape_cast %14 : vector<1xf32> to vector<1x1xf32>
    %16 = vector.broadcast %15 : vector<1x1xf32> to vector<1x128xf32>
    %17 = arith.subf %13, %16 : vector<1x128xf32>
    %18 = math.exp %17 : vector<1x128xf32>
    %cst_13 = arith.constant dense<0.000000e+00> : vector<1xf32>
    %19 = vector.multi_reduction <add>, %18, %cst_13 [1] : vector<1x128xf32> to vector<1xf32>
    %20 = vector.shape_cast %19 : vector<1xf32> to vector<1x1xf32>
    %21 = tpu.reciprocal %20 : vector<1x1xf32> -> vector<1x1xf32>
    %22 = vector.broadcast %21 : vector<1x1xf32> to vector<1x128xf32>
    %23 = arith.mulf %18, %22 : vector<1x128xf32>
    %c0_14 = arith.constant 0 : index
    %c0_15 = arith.constant 0 : index
    %24 = vector.load %arg16[%c0_14, %c0_15] : memref<1x128xf32, #tpu.memory_space<vmem>>, vector<1x128xf32>
    tpu.vector_store %arg16[%c0_14, %c0_15], %23 {strides = array<i32>} : memref<1x128xf32, #tpu.memory_space<vmem>>, vector<1x128xf32>,
    %c0_16 = arith.constant 0 : index
    %c0_17 = arith.constant 0 : index
    %25 = vector.load %arg3[%c0_16, %c0_17] : memref<128x32xf32, #tpu.memory_space<vmem>>, vector<128x32xf32>
    %cst_18 = arith.constant dense<0.000000e+00> : vector<1x32xf32>
    %26 = tpu.matmul %23, %25, %cst_18 {dimension_numbers = #tpu.dot_dimension_numbers<[1], [0], [0], [1], [0, 0, 1, 1], [], []>} : vector<1x128xf32>, vector<128x32xf32>, vector<1x32xf32> -> vector<1x32xf32>
    %27 = vector.extract_strided_slice %8 {offsets = [0, 128], sizes = [1, 32], strides = [1, 1]} : vector<1x160xf32> to vector<1x32xf32>
    %c0_19 = arith.constant 0 : index
    %c0_20 = arith.constant 0 : index
    %28 = vector.load %arg6[%c0_19, %c0_20] : memref<32x32xf32, #tpu.memory_space<vmem>>, vector<32x32xf32>
    %cst_21 = arith.constant dense<0.000000e+00> : vector<1x32xf32>
    %29 = tpu.matmul %26, %28, %cst_21 {dimension_numbers = #tpu.dot_dimension_numbers<[1], [0], [0], [1], [0, 0, 1, 1], [], []>} : vector<1x32xf32>, vector<32x32xf32>, vector<1x32xf32> -> vector<1x32xf32>
    %30 = arith.addf %27, %29 : vector<1x32xf32>
    %c0_22 = arith.constant 0 : index
    %c0_23 = arith.constant 0 : index
    %31 = vector.load %arg10[%c0_22, %c0_23] : memref<1x32xf32, #tpu.memory_space<vmem>>, vector<1x32xf32>
    %32 = arith.addf %30, %31 : vector<1x32xf32>
    %cst_24 = arith.constant 0.000000e+00 : f32
    %33 = vector.broadcast %cst_24 : f32 to vector<1x32xf32>
    %34 = arith.maximumf %32, %33 : vector<1x32xf32>
    %c0_25 = arith.constant 0 : index
    %c0_26 = arith.constant 0 : index
    %35 = vector.load %arg7[%c0_25, %c0_26] : memref<32x96xf32, #tpu.memory_space<vmem>>, vector<32x96xf32>
    %cst_27 = arith.constant dense<0.000000e+00> : vector<1x96xf32>
    %36 = tpu.matmul %34, %35, %cst_27 {dimension_numbers = #tpu.dot_dimension_numbers<[1], [0], [0], [1], [0, 0, 1, 1], [], []>} : vector<1x32xf32>, vector<32x96xf32>, vector<1x96xf32> -> vector<1x96xf32>
    %c0_28 = arith.constant 0 : index
    %c0_29 = arith.constant 0 : index
    %37 = vector.load %arg11[%c0_28, %c0_29] : memref<1x96xf32, #tpu.memory_space<vmem>>, vector<1x96xf32>
    %38 = arith.addf %36, %37 : vector<1x96xf32>
    %39 = vector.extract_strided_slice %4 {offsets = [0, 128], sizes = [1, 96], strides = [1, 1]} : vector<1x224xf32> to vector<1x96xf32>
    %c0_30 = arith.constant 0 : index
    %c0_31 = arith.constant 0 : index
    %40 = vector.load %arg12[%c0_30, %c0_31] : memref<1x96xf32, #tpu.memory_space<vmem>>, vector<1x96xf32>
    %41 = arith.addf %39, %40 : vector<1x96xf32>
    %42 = vector.extract_strided_slice %38 {offsets = [0, 0], sizes = [1, 32], strides = [1, 1]} : vector<1x96xf32> to vector<1x32xf32>
    %43 = vector.extract_strided_slice %41 {offsets = [0, 0], sizes = [1, 32], strides = [1, 1]} : vector<1x96xf32> to vector<1x32xf32>
    %44 = arith.addf %42, %43 : vector<1x32xf32>
    %45 = arith.negf %44 : vector<1x32xf32>
    %46 = math.exp %45 : vector<1x32xf32>
    %cst_32 = arith.constant 1.000000e+00 : f32
    %47 = vector.broadcast %cst_32 : f32 to vector<1x32xf32>
    %48 = arith.addf %47, %46 : vector<1x32xf32>
    %49 = arith.divf %47, %48 : vector<1x32xf32>
    %50 = vector.extract_strided_slice %38 {offsets = [0, 32], sizes = [1, 32], strides = [1, 1]} : vector<1x96xf32> to vector<1x32xf32>
    %51 = vector.extract_strided_slice %41 {offsets = [0, 32], sizes = [1, 32], strides = [1, 1]} : vector<1x96xf32> to vector<1x32xf32>
    %52 = arith.addf %50, %51 : vector<1x32xf32>
    %53 = arith.negf %52 : vector<1x32xf32>
    %54 = math.exp %53 : vector<1x32xf32>
    %cst_33 = arith.constant 1.000000e+00 : f32
    %55 = vector.broadcast %cst_33 : f32 to vector<1x32xf32>
    %56 = arith.addf %55, %54 : vector<1x32xf32>
    %57 = arith.divf %55, %56 : vector<1x32xf32>
    %58 = vector.extract_strided_slice %38 {offsets = [0, 64], sizes = [1, 32], strides = [1, 1]} : vector<1x96xf32> to vector<1x32xf32>
    %59 = vector.extract_strided_slice %41 {offsets = [0, 64], sizes = [1, 32], strides = [1, 1]} : vector<1x96xf32> to vector<1x32xf32>
    %60 = arith.mulf %49, %59 : vector<1x32xf32>
    %61 = arith.addf %58, %60 : vector<1x32xf32>
    %62 = math.tanh %61 : vector<1x32xf32>
    %cst_34 = arith.constant 1.000000e+00 : f32
    %63 = vector.broadcast %cst_34 : f32 to vector<1x32xf32>
    %64 = arith.subf %63, %57 : vector<1x32xf32>
    %65 = arith.mulf %64, %62 : vector<1x32xf32>
    %66 = arith.mulf %57, %2 : vector<1x32xf32>
    %67 = arith.addf %65, %66 : vector<1x32xf32>
    %c0_35 = arith.constant 0 : index
    %c0_36 = arith.constant 0 : index
    %68 = vector.load %arg15[%c0_35, %c0_36] : memref<1x32xf32, #tpu.memory_space<vmem>>, vector<1x32xf32>
    tpu.vector_store %arg15[%c0_35, %c0_36], %67 {strides = array<i32>} : memref<1x32xf32, #tpu.memory_space<vmem>>, vector<1x32xf32>,
    %c0_37 = arith.constant 0 : index
    %c0_38 = arith.constant 0 : index
    %69 = vector.load %arg8[%c0_37, %c0_38] : memref<32x64xf32, #tpu.memory_space<vmem>>, vector<32x64xf32>
    %cst_39 = arith.constant dense<0.000000e+00> : vector<1x64xf32>
    %70 = tpu.matmul %67, %69, %cst_39 {dimension_numbers = #tpu.dot_dimension_numbers<[1], [0], [0], [1], [0, 0, 1, 1], [], []>} : vector<1x32xf32>, vector<32x64xf32>, vector<1x64xf32> -> vector<1x64xf32>
    %c0_40 = arith.constant 0 : index
    %c0_41 = arith.constant 0 : index
    %71 = vector.load %arg13[%c0_40, %c0_41] : memref<1x64xf32, #tpu.memory_space<vmem>>, vector<1x64xf32>
    %72 = arith.addf %70, %71 : vector<1x64xf32>
    %cst_42 = arith.constant dense<0xFF800000> : vector<1xf32>
    %73 = vector.multi_reduction <maximumf>, %72, %cst_42 [1] : vector<1x64xf32> to vector<1xf32>
    %74 = vector.shape_cast %73 : vector<1xf32> to vector<1x1xf32>
    %75 = vector.broadcast %74 : vector<1x1xf32> to vector<1x64xf32>
    %76 = arith.subf %72, %75 : vector<1x64xf32>
    %77 = math.exp %76 : vector<1x64xf32>
    %cst_43 = arith.constant dense<0.000000e+00> : vector<1xf32>
    %78 = vector.multi_reduction <add>, %77, %cst_43 [1] : vector<1x64xf32> to vector<1xf32>
    %79 = vector.shape_cast %78 : vector<1xf32> to vector<1x1xf32>
    %80 = math.log %79 : vector<1x1xf32>
    %81 = arith.addf %74, %80 : vector<1x1xf32>
    %82 = vector.broadcast %81 : vector<1x1xf32> to vector<1x64xf32>
    %83 = arith.subf %72, %82 : vector<1x64xf32>
    %c0_44 = arith.constant 0 : index
    %c0_45 = arith.constant 0 : index
    %84 = vector.load %arg14[%c0_44, %c0_45] : memref<1x64xf32, #tpu.memory_space<vmem>>, vector<1x64xf32>
    tpu.vector_store %arg14[%c0_44, %c0_45], %83 {strides = array<i32>} : memref<1x64xf32, #tpu.memory_space<vmem>>, vector<1x64xf32>,
    return
  }
}

</mosaic_0001>

<bundles_post_ra>
// kernel: tpu_custom_call.1
= control target key start
LH: loop header
LB: loop body
LE: loop exit
PB: predicated region body
PF: predicated region fallthrough
CT: control target
= control target key end

     0   :  { %s1309_s0 = inlined_call_operand.<no memory space> [shape: s32[1], index: 0, kind: input, shape index: {}]   ;;  %s1310_s1 = inlined_call_operand.vmem [shape: f32[64,32], index: 1, kind: input, shape index: {}]   ;;  %s1311_s2 = inlined_call_operand.vmem [shape: f32[1,32], index: 2, kind: input, shape index: {}]   ;;  %s1312_s3 = inlined_call_operand.vmem [shape: f32[128,32], index: 3, kind: input, shape index: {}]   ;;  %s1313_s4 = inlined_call_operand.vmem [shape: f32[32,160], index: 4, kind: input, shape index: {}]   ;;  %s1314_s5 = inlined_call_operand.vmem [shape: f32[32,224], index: 5, kind: input, shape index: {}]   ;;  %s1315_s6 = inlined_call_operand.vmem [shape: f32[32,32], index: 6, kind: input, shape index: {}]   ;;  %s1316_s7 = inlined_call_operand.vmem [shape: f32[32,96], index: 7, kind: input, shape index: {}]   ;;  %s1317_s8 = inlined_call_operand.vmem [shape: f32[32,64], index: 8, kind: input, shape index: {}]   ;;  %s1318_s9 = inlined_call_operand.vmem [shape: f32[1,128], index: 9, kind: input, shape index: {}]   ;;  %s1319_s10 = inlined_call_operand.vmem [shape: f32[1,32], index: 10, kind: input, shape index: {}]   ;;  %s1320_s11 = inlined_call_operand.vmem [shape: f32[1,96], index: 11, kind: input, shape index: {}]   ;;  %s1321_s12 = inlined_call_operand.vmem [shape: f32[1,96], index: 12, kind: input, shape index: {}]   ;;  %s1322_s13 = inlined_call_operand.vmem [shape: f32[1,64], index: 13, kind: input, shape index: {}]   ;;  %s1323_s14 = inlined_call_operand.hbm [shape: f32[1,64], index: 14, kind: output, shape index: {0}]   ;;  %s1324_s15 = inlined_call_operand.hbm [shape: f32[1,32], index: 15, kind: output, shape index: {1}]   ;;  %s1325_s16 = inlined_call_operand.hbm [shape: f32[1,128], index: 16, kind: output, shape index: {2}]  }
   0x1   :  { %1326 = sst [smem:[#allocation14_spill]] %s1309_s0 }
   0x2   :  { %23 = vsyncpa [#allocation6], 0 }
   0x3   :  { %24 = vsyncpa [#allocation8], 0  ;;  %s1327_s23 = sld [smem:[#allocation14_spill]] }
   0x9   :  { %s52_s26 = scalar_lea.vmem %s1310_s1, %s1327_s23 }
   0xa   :  { %v70_v0 = vld [vmem:[%s52_s26] sm:$0x1] }
   0xb   :  { %71 = vst [vmem:[#allocation2] sm:$0x1] %v70_v0 }
   0xc   :  { %96 = vsyncadd [#allocation3], 16  ;;  %v99_v1 = vld [vmem:[%s1314_s5 + $0x8] sm:$0xff]  ;;  %v101_v2 = vld [vmem:[%s1314_s5 + $0x18] sm:$0xff]  ;;  %v979_v7 = vmov 0.0   ;;  %vm106_vm0 = vcmask 261120  }
   0xd   :  { %v826_v3 = vpack.c.bf16 %v101_v2, %v99_v1  ;;  %v98_v4 = vld [vmem:[%s1314_s5] sm:$0xff]  ;;  %v100_v5 = vld [vmem:[%s1314_s5 + $0x10] sm:$0xff]  ;;  %v103_v6 = vld [vmem:[%s1314_s5 + $0x28] sm:$0xff]  ;;  %174 = vmatprep.mubr.f32.mxu0 %v979_v7 }
   0xe   :  { %v828_v8 = vpack.c.bf16 %v100_v5, %v98_v4  ;;  %v105_v9 = vld [vmem:[%s1314_s5 + $0x38] sm:$0xff]  ;;  %v102_v10 = vld [vmem:[%s1314_s5 + $0x20] sm:$0xff]  ;;  %v104_v11 = vld [vmem:[%s1314_s5 + $0x30] sm:$0xff] }
   0xf   :  { %827 = vmatprep.subr.bf16.mxu0 %v826_v3  ;;  %v830_v12 = vpack.c.bf16 %v105_v9, %v103_v6  ;;  %v832_v13 = vpack.c.bf16 %v104_v11, %v102_v10  ;;  %v1107_v14 = vld [vmem:[%s1311_s2] sm:$0x1] }
  0x10   :  { %829 = vmatpush1.bf16.msra.mxu0 %v828_v8 }
  0x11   :  { %831 = vmatprep.subr.bf16.mxu0 %v830_v12 }
  0x14   :  { %833 = vmatpush1.bf16.msra.mxu0 %v832_v13 }
  0x17   :  { %719 = vmatmul.mubr.msk.f32.vlgmr.msra.gmra.mrb[0].mxu0 %vm106_vm0, %v1107_v14 }
  0xea   :  { %v176_v15 = vpop.f32.mrb[0].mxu0 }
  0xeb   :  { %v1111_v16 = vpop.f32.mrb[1].mxu0 }
  0xec   :  { %973 = dma.done.wait [#allocation3], 16 }
  0xed   :  { %974 = vsyncadd [#allocation3], 4294967280  ;;  %260 = vmatprep.mubr.f32.mxu1 %v979_v7  ;;  %v186_v17 = vld [vmem:[%s1313_s4 + $0x8] sm:$0xff]  ;;  %v188_v18 = vld [vmem:[%s1313_s4 + $0x18] sm:$0xff]  ;;  %vm270_vm1 = vcmask 1040384   ;;  %v980_v39 = vmov 0.0|0.0  }
  0xee   :  { %v185_v19 = vld [vmem:[%s1313_s4] sm:$0xff]  ;;  %v834_v20 = vpack.c.bf16 %v188_v18, %v186_v17  ;;  %v187_v21 = vld [vmem:[%s1313_s4 + $0x10] sm:$0xff]  ;;  %v190_v22 = vld [vmem:[%s1313_s4 + $0x28] sm:$0xff]  ;;  %842 = vmatprep.subr.bf16.mxu0 %v980_v39  ;;  %vm981_vm2 = vmmov 0   ;;  %s982_s18 = smov 64   ;;  %s984_s27 = smov 96  }
  0xef   :  { %v192_v23 = vld [vmem:[%s1313_s4 + $0x38] sm:$0xff]  ;;  %v836_v24 = vpack.c.bf16 %v187_v21, %v185_v19  ;;  %v189_v26 = vld [vmem:[%s1313_s4 + $0x20] sm:$0xff]  ;;  %v191_v27 = vld [vmem:[%s1313_s4 + $0x30] sm:$0xff]  ;;  %790 = vmatprep.mubr.msk.f32.mxu0 %vm981_vm2, %v979_v7  ;;  %vm567_vm3 = vcmask 253952   ;;  %vm646_vm4 = vcmask 516096  }
  0xf0   :  { %v838_v25 = vpack.c.bf16 %v192_v23, %v190_v22  ;;  %835 = vmatprep.subr.bf16.mxu1 %v834_v20  ;;  %v840_v28 = vpack.c.bf16 %v191_v27, %v189_v26  ;;  %v184_v29 = vld [vmem:[#allocation2] sm:$0x1]  ;;  %v284_v37 = vld [vmem:[%s1312_s3 + $0x8] sm:$0xff]  ;;  %v285_v38 = vld [vmem:[%s1312_s3 + $0x10] sm:$0xff] }
  0xf1   :  { %837 = vmatpush1.bf16.msra.mxu1 %v836_v24  ;;  %v268_v31 = vld [vmem:[%s1318_s9] sm:$0x1]  ;;  %v286_v41 = vld [vmem:[%s1312_s3 + $0x18] sm:$0xff]  ;;  %v288_v44 = vld [vmem:[%s1312_s3 + $0x28] sm:$0xff] }
  0xf2   :  { %839 = vmatprep.subr.bf16.mxu1 %v838_v25  ;;  %v283_v36 = vld [vmem:[%s1312_s3] sm:$0xff]  ;;  %v846_v42 = vpack.c.bf16 %v286_v41, %v285_v38  ;;  %v289_v46 = vld [vmem:[%s1312_s3 + $0x30] sm:$0xff]  ;;  %v290_v47 = vld [vmem:[%s1312_s3 + $0x38] sm:$0xff] }
  0xf3   :  { %v843_v40 = vpack.c.bf16 %v284_v37, %v283_v36  ;;  %v287_v43 = vld [vmem:[%s1312_s3 + $0x20] sm:$0xff]  ;;  %v852_v48 = vpack.c.bf16 %v290_v47, %v289_v46  ;;  %v292_v50 = vld [vmem:[%s1312_s3 + $0x48] sm:$0xff]  ;;  %v293_v57 = vld [vmem:[%s1312_s3 + $0x50] sm:$0xff]  ;;  %v554_v37 = vlaneseq }
  0xf4   :  { %v849_v45 = vpack.c.bf16 %v288_v44, %v287_v43  ;;  %v291_v49 = vld [vmem:[%s1312_s3 + $0x40] sm:$0xff]  ;;  %v294_v58 = vld [vmem:[%s1312_s3 + $0x58] sm:$0xff]  ;;  %v296_v61 = vld [vmem:[%s1312_s3 + $0x68] sm:$0xff] }
  0xf5   :  { %841 = vmatpush1.bf16.msra.mxu1 %v840_v28  ;;  %844 = vmatpush3.bf16.msra.mxu0 %v843_v40  ;;  %v855_v51 = vpack.c.bf16 %v292_v50, %v291_v49  ;;  %v858_v59 = vpack.c.bf16 %v294_v58, %v293_v57  ;;  %v295_v60 = vld [vmem:[%s1312_s3 + $0x60] sm:$0xff]  ;;  %v297_v63 = vld [vmem:[%s1312_s3 + $0x70] sm:$0xff]  ;;  %v298_v0 = vld [vmem:[%s1312_s3 + $0x78] sm:$0xff]  ;;  %v555_v38 = vshrl.u32 %v554_v37, 7 }
  0xf6   :  { %866 = vmatprep.subr.bf16.mxu1 %v980_v39  ;;  %845 = vmatprep.subr.bf16.mxu0 %v980_v39  ;;  %v861_v62 = vpack.c.bf16 %v296_v61, %v295_v60  ;;  %v864_v1 = vpack.c.bf16 %v298_v0, %v297_v63  ;;  %v369_v2 = vld [vmem:[%s1315_s6] sm:$0xff]  ;;  %v370_v3 = vld [vmem:[%s1315_s6 + $0x8] sm:$0xff]  ;;  %v371_v4 = vld [vmem:[%s1315_s6 + $0x10] sm:$0xff] }
  0xf7   :  { %v867_v5 = vpack.c.bf16 %v370_v3, %v369_v2  ;;  %v372_v6 = vld [vmem:[%s1315_s6 + $0x18] sm:$0xff]  ;;  %v451_v17 = vld [vmem:[%s1316_s7 + $0x8] sm:$0xff]  ;;  %v452_v19 = vld [vmem:[%s1316_s7 + $0x10] sm:$0xff]  ;;  %v556_v41 = vsub.s32 0, %v555_v38  ;;  %s985_s6 = smov [#allocation7]  }
  0xf8   :  { %720 = vmatmul.mubr.msk.f32.vlgmr.msra.gmra.mrb[0].mxu1 %vm106_vm0, %v184_v29  ;;  %v870_v8 = vpack.c.bf16 %v372_v6, %v371_v4  ;;  %v453_v20 = vld [vmem:[%s1316_s7 + $0x18] sm:$0xff]  ;;  %v528_v22 = vld [vmem:[%s1321_s12] sm:$0x1]  ;;  %v570_v47 = vld [vmem:[%s1317_s8 + $0x8] sm:$0xff]  ;;  %s677_s28 = sshll.u32 %s985_s6, 4  ;;  %s678_s28 = int_to_ptr.vmem [resolvable:$true] %s677_s28 }
  0xf9   :  { %847 = vmatpush3.bf16.msra.mxu0 %v846_v42  ;;  %801 = vmatprep.mubr.msk.f32.mxu1 %vm981_vm2, %v979_v7  ;;  %v876_v21 = vpack.c.bf16 %v453_v20, %v452_v19  ;;  %v529_v23 = vadd.f32 %v528_v22, %v1111_v16  ;;  %v447_v25 = vld [vmem:[%s1319_s10] sm:$0x1]  ;;  %s983_s10 = smov 32   ;;  %s907_s4 = scalar_lea.vmem %s678_s28, 16 }
  0xfa   :  { %848 = vmatprep.subr.bf16.mxu0 %v980_v39  ;;  %868 = vmatpush3.bf16.msra.mxu1 %v867_v5  ;;  %v454_v16 = vld [vmem:[%s1320_s11] sm:$0x1]  ;;  %p908_p0 = scmp.ne.s32.totalorder %s678_s28, %s907_s4  ;;  %p912_p1 = scmp.lt.s32.totalorder %s678_s28, %s678_s28 }
  0xfb   :  { %869 = vmatprep.subr.bf16.mxu1 %v980_v39  ;;  %538 = vrot.lane.b32.xlu1 %v529_v23, %s982_s18  ;;  %v569_v46 = vld [vmem:[%s1317_s8] sm:$0xff] }
  0xfc   :  { %v879_v49 = vpack.c.bf16 %v570_v47, %v569_v46 }
  0xfd   :  { %850 = vmatpush3.bf16.msra.mxu0 %v849_v45 }
  0xfe   :  { %851 = vmatprep.subr.bf16.mxu0 %v980_v39  ;;  %871 = vmatpush3.bf16.msra.mxu1 %v870_v8 }
  0xff   :  { %872 = vmatprep.subr.bf16.mxu1 %v980_v39 }
 0x101   :  { %853 = vmatpush3.bf16.msra.mxu0 %v852_v48  ;;  %v571_v48 = vld [vmem:[%s1317_s8 + $0x10] sm:$0xff] }
 0x102   :  { %854 = vmatprep.subr.bf16.mxu0 %v980_v39 }
 0x105   :  { %856 = vmatpush3.bf16.msra.mxu0 %v855_v51 }
 0x106   :  { %857 = vmatprep.subr.bf16.mxu0 %v980_v39 }
 0x109   :  { %859 = vmatpush3.bf16.msra.mxu0 %v858_v59 }
 0x10a   :  { %860 = vmatprep.subr.bf16.mxu0 %v980_v39 }
 0x10d   :  { %862 = vmatpush3.bf16.msra.mxu0 %v861_v62 }
 0x10e   :  { %863 = vmatprep.subr.bf16.mxu0 %v980_v39 }
 0x111   :  { %865 = vmatpush3.bf16.msra.mxu0 %v864_v1 }
 0x16d   :  { %v539_v40 = vpop.permute.xlu1 %538 }
 0x1cb   :  { %v262_v30 = vpop.f32.mrb[0].mxu1 }
 0x1cc   :  { %v267_v32 = vadd.f32 %v262_v30, %v176_v15  ;;  %v1142_v33 = vpop.f32.mrb[1].mxu1  ;;  %v450_v15 = vld [vmem:[%s1316_s7] sm:$0xff] }
 0x1cd   :  { %v873_v18 = vpack.c.bf16 %v451_v17, %v450_v15 }
 0x1ce   :  { %v269_v34 = vadd.f32 %v268_v31, %v267_v32 }
 0x1d0   :  { %v271_v35 = vsel %vm270_vm1, %v269_v34, -inf }
 0x1d1   :  { %272 = vmax.xlane.f32.xlu0 %v271_v35 }
 0x25e   :  { %v273_v52 = vpop.xlane.xlu0 %272 }
 0x25f   :  { %v274_v53 = vsub.f32 %v269_v34, %v273_v52 }
 0x261   :  { %v275_v54 = vmul.f32 1.442695, %v274_v53 }
 0x263   :  { %893 = vpow2.f32 %v275_v54 }
 0x26d   :  { %v894_v55 = vpop.eup %893 }
 0x26e   :  { %v277_v56 = vsel %vm270_vm1, %v894_v55, 0.0 }
 0x26f   :  { %278 = vadd.xlane.f32.xlu0 %v277_v56 }
 0x2fc   :  { %v279_v9 = vpop.xlane.xlu0 %278 }
 0x2fd   :  { %895 = vrcp.f32 %v279_v9 }
 0x307   :  { %v896_v10 = vpop.eup %895 }
 0x308   :  { %v281_v11 = vmul.f32 %v896_v10, %v894_v55 }
 0x30a   :  { %791 = vmatmul.mubr.f32.vlgmr.msra.gmra.mrb[2].mxu0 %v281_v11  ;;  %282 = vst [vmem:[#allocation9] sm:$0x1] %v281_v11 }
 0x3dd   :  { %v365_v12 = vpop.f32.mrb[2].mxu0 }
 0x3de   :  { %v792_v13 = vpop.f32.mrb[3].mxu0  ;;  %802 = vmatmul.mubr.msk.f32.vlgmr.msra.gmra.mrb[2].mxu1 %vm106_vm0, %v365_v12 }
 0x3df   :  { %812 = vmatprep.mubr.msk.f32.mxu1 %vm981_vm2, %v979_v7  ;;  %874 = vmatpush3.bf16.msra.mxu1 %v873_v18 }
 0x3e0   :  { %875 = vmatprep.subr.bf16.mxu1 %v980_v39 }
 0x3e3   :  { %877 = vmatpush3.bf16.msra.mxu1 %v876_v21 }
 0x3e4   :  { %878 = vmatprep.subr.bf16.mxu1 %v980_v39 }
 0x4b1   :  { %v442_v24 = vpop.f32.mrb[2].mxu1 }
 0x4b2   :  { %v446_v26 = vadd.f32 %v442_v24, %v1142_v33  ;;  %v803_v27 = vpop.f32.mrb[3].mxu1 }
 0x4b4   :  { %v448_v28 = vadd.f32 %v447_v25, %v446_v26 }
 0x4b6   :  { %v449_v29 = vmax.f32 %v448_v28, 0.0 }
 0x4b8   :  { %813 = vmatmul.mubr.msk.f32.vlgmr.msra.gmra.mrb[4].mxu1 %vm106_vm0, %v449_v29 }
 0x4b9   :  { %823 = vmatprep.mubr.msk.f32.mxu1 %vm981_vm2, %v979_v7  ;;  %v557_v7 = vrot.slane %v1107_v14, %v556_v41  ;;  %v572_v14 = vld [vmem:[%s1317_s8 + $0x18] sm:$0xff]  ;;  %880 = vmatpush3.bf16.msra.mxu1 %v879_v49 }
 0x4ba   :  { %v882_v50 = vpack.c.bf16 %v572_v14, %v571_v48  ;;  %881 = vmatprep.subr.bf16.mxu1 %v980_v39  ;;  %v573_v39 = vld [vmem:[%s1322_s13] sm:$0x1]  ;;  %s911_s13 = scalar_lea.vmem %s678_s28, 32 }
 0x4bb   :  { %p913_p2 = scmp.lt.s32.totalorder %s911_s13, %s907_s4 }
 0x4bd   :  { %883 = vmatpush3.bf16.msra.mxu1 %v882_v50  ;;  %p914_p3 = por %p913_p2, %p912_p1 }
 0x4bf   :  { %p915_p4 = pnand %p914_p3, %p908_p0 }
 0x58b   :  { %v524_v30 = vpop.f32.mrb[4].mxu1 }
 0x58c   :  { %v525_v31 = vadd.f32 %v524_v30, %v454_v16  ;;  %v814_v32 = vpop.f32.mrb[5].mxu1 }
 0x58e   :  { %v530_v34 = vadd.f32 %v529_v23, %v525_v31 }
 0x590   :  { %v723_v35 = vmul.f32 -1.442695, %v530_v34 }
 0x592   :  { %897 = vpow2.f32 %v723_v35 }
 0x59c   :  { %v898_v36 = vpop.eup %897 }
 0x59d   :  { %v534_v33 = vadd.f32 1.0, %v898_v36 }
 0x59f   :  { %899 = vrcp.f32 %v534_v33 }
 0x5a9   :  { %v900_v42 = vpop.eup %899 }
 0x5aa   :  { %v541_v43 = vmul.f32 %v900_v42, %v539_v40  ;;  %v548_v53 = vsub.f32 1.0, %v900_v42 }
 0x5ac   :  { %543 = vrot.lane.b32.xlu1 %v541_v43, %s982_s18 }
 0x5b0   :  { %558 = vrot.lane.b32.xlu1 %v557_v7, %s983_s10 }
 0x61e   :  { %v544_v44 = vpop.permute.xlu1 %543 }
 0x61f   :  { %v546_v45 = vadd.f32 %v544_v44, %v525_v31 }
 0x621   :  { %901 = vtanh.f32 %v546_v45 }
 0x622   :  { %v559_v52 = vpop.permute.xlu1 %558 }
 0x623   :  { %v561_v55 = vmul.f32 %v900_v42, %v559_v52 }
 0x62b   :  { %v902_v51 = vpop.eup %901 }
 0x62c   :  { %550 = vrot.lane.b32.xlu0 %v902_v51, %s984_s27 }
 0x69e   :  { %v551_v54 = vpop.permute.xlu0 %550 }
 0x69f   :  { %v553_v56 = vmul.f32 %v551_v54, %v548_v53 }
 0x6a1   :  { %v562_v57 = vadd.f32 %v561_v55, %v553_v56 }
 0x6a3   :  { %564 = vrot.lane.b32.xlu1 %v562_v57, %s984_s27 }
 0x715   :  { %v565_v58 = vpop.permute.xlu1 %564 }
 0x716   :  { %824 = vmatmul.mubr.msk.f32.vlgmr.msra.gmra.mrb[6].mxu1 %vm106_vm0, %v565_v58  ;;  %568 = vst.msk [vmem:[#allocation7] sm:$0x1] %vm567_vm3, %v565_v58 }
 0x7e9   :  { %v642_v59 = vpop.f32.mrb[6].mxu1 }
 0x7ea   :  { %v643_v60 = vadd.f32 %v642_v59, %v573_v39  ;;  %v825_v61 = vpop.f32.mrb[7].mxu1 }
 0x7ec   :  { %v647_v62 = vsel %vm646_vm4, %v643_v60, -inf }
 0x7ed   :  { %648 = vmax.xlane.f32.xlu1 %v647_v62 }
 0x87a   :  { %v649_v63 = vpop.xlane.xlu1 %648 }
 0x87b   :  { %v650_v0 = vsub.f32 %v643_v60, %v649_v63 }
 0x87d   :  { %v651_v1 = vmul.f32 1.442695, %v650_v0 }
 0x87f   :  { %903 = vpow2.f32 %v651_v1 }
 0x889   :  { %v904_v2 = vpop.eup %903 }
 0x88a   :  { %v653_v3 = vsel %vm646_vm4, %v904_v2, 0.0 }
 0x88b   :  { %654 = vadd.xlane.f32.xlu0 %v653_v3 }
 0x88c   :  { %918 = shalt.err (!%p915_p4)
}
 0x88d   :  { %s919_s30 = scalar_lea.hbm %s1324_s15, 16 }
 0x88e   :  { %p920_p5 = scmp.ne.s32.totalorder %s1324_s15, %s919_s30  ;;  %p923_p6 = scmp.lt.u32.totalorder %s919_s30, %s1324_s15 }
 0x890   :  { %p925_p7 = pnand %p923_p6, %p920_p5 }
 0x892   :  { %928 = shalt.err (!%p925_p7)
}
 0x893   :  { %680 = dma.vmem_to_hbm [thread:$0]  %s678_s28, 16, %s1324_s15, [#allocation8]  }
 0x894   :  { %s986_s1 = smov [#allocation9]  }
 0x895   :  { %s687_s7 = sshll.u32 %s986_s1, 4  ;;  %s688_s7 = int_to_ptr.vmem [resolvable:$true] %s687_s7 }
 0x896   :  { %s929_s12 = scalar_lea.vmem %s688_s7, 16  ;;  %s933_s10 = scalar_lea.vmem %s688_s7, 32 }
 0x897   :  { %p930_p8 = scmp.ne.s32.totalorder %s688_s7, %s929_s12  ;;  %p934_p9 = scmp.lt.s32.totalorder %s688_s7, %s688_s7 }
 0x898   :  { %p935_p10 = scmp.lt.s32.totalorder %s933_s10, %s929_s12 }
 0x89a   :  { %p936_p11 = por %p935_p10, %p934_p9 }
 0x89c   :  { %p937_p12 = pnand %p936_p11, %p930_p8 }
 0x89e   :  { %940 = shalt.err (!%p937_p12)
}
 0x89f   :  { %s941_s21 = scalar_lea.hbm %s1325_s16, 16 }
 0x8a0   :  { %p942_p13 = scmp.ne.s32.totalorder %s1325_s16, %s941_s21  ;;  %p945_p0 = scmp.lt.u32.totalorder %s941_s21, %s1325_s16 }
 0x8a2   :  { %p947_p1 = pnand %p945_p0, %p942_p13 }
 0x8a4   :  { %950 = shalt.err (!%p947_p1)
}
 0x8a5   :  { %690 = dma.vmem_to_hbm [thread:$0]  %s688_s7, 16, %s1325_s16, [#allocation8]  }
 0x8a6   :  { %s987_s27 = smov [#allocation5]  }
 0x8a7   :  { %s667_s8 = sshll.u32 %s987_s27, 4  ;;  %s668_s8 = int_to_ptr.vmem [resolvable:$true] %s667_s8 }
 0x8a8   :  { %s951_s3 = scalar_lea.vmem %s668_s8, 16  ;;  %s955_s6 = scalar_lea.vmem %s668_s8, 32 }
 0x8a9   :  { %p952_p2 = scmp.ne.s32.totalorder %s668_s8, %s951_s3  ;;  %p956_p3 = scmp.lt.s32.totalorder %s668_s8, %s668_s8 }
 0x8aa   :  { %p957_p4 = scmp.lt.s32.totalorder %s955_s6, %s951_s3 }
 0x8ac   :  { %p958_p5 = por %p957_p4, %p956_p3 }
 0x8ae   :  { %p959_p6 = pnand %p958_p5, %p952_p2 }
 0x918   :  { %v655_v4 = vpop.xlane.xlu0 %654 }
 0x919   :  { %905 = vlog2.f32 %v655_v4 }
 0x923   :  { %v906_v5 = vpop.eup %905 }
 0x924   :  { %v657_v6 = vmul.f32 0.6931472, %v906_v5 }
 0x926   :  { %v658_v8 = vadd.f32 %v657_v6, %v649_v63 }
 0x928   :  { %v659_v9 = vsub.f32 %v643_v60, %v658_v8 }
 0x92a   :  { %660 = vst.msk [vmem:[#allocation5] sm:$0x1] %vm646_vm4, %v659_v9 }
 0x92b   :  { %962 = shalt.err (!%p959_p6)
}
 0x92c   :  { %s963_s4 = scalar_lea.hbm %s1323_s14, 16 }
 0x92d   :  { %p964_p7 = scmp.ne.s32.totalorder %s1323_s14, %s963_s4  ;;  %p967_p8 = scmp.lt.u32.totalorder %s963_s4, %s1323_s14 }
 0x92f   :  { %p969_p9 = pnand %p967_p8, %p964_p7 }
 0x931   :  { %972 = shalt.err (!%p969_p9)
}
 0x932   :  { %670 = dma.vmem_to_hbm [thread:$0]  %s668_s8, 16, %s1323_s14, [#allocation6]  }
 0x933   :  { %975 = dma.done.wait [#allocation6], 16  }
 0x934   :  { %976 = vsyncadd [#allocation6], 4294967280 }
 0x935   :  { %977 = dma.done.wait [#allocation8], 32  }
 0x936   :  { %978 = vsyncadd [#allocation8], 4294967264 }
 0x937   :  { %700 = vsyncpa [#allocation6], 1 }
 0x938   :  { %701 = vsyncpa [#allocation8], 1 }
 0x939   :  { %702 = vsyncmov [#allocation3] }
 0x93c   :  { %s703_s9 = vpop.sfrf %702 }
 0x93d   :  { %p725_p10 = scmp.ne.s32.totalorder %s703_s9, 0 }
 0x93f   :  { %707 = shalt.err (%p725_p10)  }

</bundles_post_ra>
